<compile_context>
chip_gen: v5e
topology: v5e:2x2
jax: 0.10.0
libtpu: 0.0.40
codegen_flags: <defaults>
</compile_context>

<pallas_src>
import jax
import jax.numpy as jnp
from jax.experimental import pallas as pl
from jax.experimental.pallas import tpu as pltpu


def _lane_fold(v):
    """Tree-sum a (rows, k*128) f32 value down to (rows, 128) using only VPU adds."""
    n = v.shape[1] // 128
    chunks = [v[:, k * 128:(k + 1) * 128] for k in range(n)]
    while len(chunks) > 1:
        nxt = [chunks[a] + chunks[a + 1] for a in range(0, len(chunks) - 1, 2)]
        if len(chunks) % 2:
            nxt.append(chunks[-1])
        chunks = nxt
    return chunks[0]


def _combined_loss_kernel(pred_ref, targ_ref, out_ref,
                          bce_acc, inter_acc, union_acc):
    """Grid = (row_tiles [par], hw_split [par], hw_tiles [arbitrary, innermost])."""
    j = pl.program_id(2)

    @pl.when(j == 0)
    def _init():
        bce_acc[...] = jnp.zeros_like(bce_acc)
        inter_acc[...] = jnp.zeros_like(inter_acc)
        union_acc[...] = jnp.zeros_like(union_acc)

    x = pred_ref[...].astype(jnp.float32)
    t = targ_ref[...].astype(jnp.float32)

    # Shared transcendental: e = exp(-|x|) feeds both the numerically-stable
    # BCE-with-logits term and a stable sigmoid.
    e = jnp.exp(-jnp.abs(x))
    bce_elem = jnp.maximum(x, 0.0) - x * t + jnp.log1p(e)
    r = pl.reciprocal(1.0 + e, approx=True)   # sigmoid(|x|), EUP approx recip
    p = jnp.where(x >= 0.0, r, e * r)         # sigmoid(x), numerically stable

    # Lane-wide partial sums kept in VMEM across the hw (reduction) axis.
    bce_acc[...] += _lane_fold(bce_elem)
    inter_acc[...] += _lane_fold(p * t)
    union_acc[...] += _lane_fold(p + t)

    @pl.when(j == pl.num_programs(2) - 1)
    def _finalize():
        out_ref[0, :, 0:1] = jnp.sum(bce_acc[...], axis=1, keepdims=True)
        out_ref[0, :, 1:2] = jnp.sum(inter_acc[...], axis=1, keepdims=True)
        out_ref[0, :, 2:3] = jnp.sum(union_acc[...], axis=1, keepdims=True)


def _round_up(x, m):
    return ((x + m - 1) // m) * m


def _largest_divisor_multiple(total, base, limit):
    """Largest divisor of `total` that is a multiple of `base` and <= limit."""
    limit = max(base, min(limit, total))
    t = (limit // base) * base
    while t >= base:
        if total % t == 0:
            return t
        t -= base
    return base


def _vmem_capacity_bytes():
    try:
        info = pltpu.get_tpu_info()
        cap = getattr(info, "vmem_capacity_bytes", None)
        if cap:
            return int(cap)
    except Exception:
        pass
    return 64 * 1024 * 1024   # conservative: v7x has the smallest VMEM (64 MiB/TC)


def combined_loss(pred, target, *, alpha=0.5, smooth=1e-6, target_in_bf16=True):
    """alpha * BCEWithLogits(pred, target) + (1 - alpha) * DiceLoss(pred, target)."""
    assert pred.shape == target.shape and pred.ndim == 4
    n, c, h, w = pred.shape
    rows, hw = n * c, h * w

    pred2 = pred.reshape(rows, hw)            # keep caller dtype (bf16 pred OK)
    targ2 = target.reshape(rows, hw)
    if target_in_bf16 and targ2.dtype != jnp.bfloat16:
        # Binary {0,1} masks are exact in bf16; halves the target's HBM bytes.
        # TODO(synk): expose opt-out for genuinely soft (non-binary) targets.
        targ2 = targ2.astype(jnp.bfloat16)

    pred_b = jnp.dtype(pred2.dtype).itemsize
    targ_b = jnp.dtype(targ2.dtype).itemsize

    # ---- pad to TPU-friendly multiples; padding is exactly loss-neutral ------
    rows_p = _round_up(rows, 8)
    hw_p = _round_up(hw, 128)
    if rows_p != rows or hw_p != hw:
        # pred padded with a large-negative (finite, even in fp16) logit, target
        # with 0:  bce = 0, sigmoid = 0, inter = 0, union = 0  -> zero contribution.
        pred2 = jnp.pad(pred2, ((0, rows_p - rows), (0, hw_p - hw)),
                        constant_values=-30000.0)
        targ2 = jnp.pad(targ2, ((0, rows_p - rows), (0, hw_p - hw)),
                        constant_values=0)

    # ---- VMEM-budget / dtype-aware tile selection ----------------------------
    vmem_cap = _vmem_capacity_bytes()
    pipeline_budget = int(0.65 * vmem_cap)        # 2 inputs x 2 buffers + accumulators
    target_block_bytes = 8 * 1024 * 1024          # per (larger) input per pipeline buffer
    max_item = max(pred_b, targ_b)

    hw_cap = max(128, min(8192, target_block_bytes // (8 * max_item)))
    hw_tile = _largest_divisor_multiple(hw_p, 128, hw_cap)

    row_base = 16 if (min(pred_b, targ_b) <= 2 and rows_p % 16 == 0) else 8
    row_cap = min(target_block_bytes // (hw_tile * max_item),
                  pipeline_budget // (2 * hw_tile * (pred_b + targ_b) + 3 * 128 * 4))
    # Cap so there are >=2 row tiles whenever possible (dual-TC sharding on v7x).
    row_cap = min(max(row_base, row_cap), max(row_base, rows_p // 2))
    row_tile = _largest_divisor_multiple(rows_p, row_base, row_cap)

    num_row_tiles = rows_p // row_tile
    num_hw_tiles = hw_p // hw_tile

    # If N*C gives only one parallel row tile, split the hw axis 2-way instead.
    hw_split = 1
    if num_row_tiles == 1 and num_hw_tiles >= 2:
        if num_hw_tiles % 2 == 1 and hw_tile % 256 == 0:
            hw_tile //= 2
            num_hw_tiles = hw_p // hw_tile
        if num_hw_tiles % 2 == 0:
            hw_split = 2
    hw_inner = num_hw_tiles // hw_split

    grid = (num_row_tiles, hw_split, hw_inner)

    block_in_bytes = row_tile * hw_tile * (pred_b + targ_b)
    footprint = (2 * block_in_bytes               # double-buffered inputs
                 + 3 * row_tile * 128 * 4         # lane-wide accumulators
                 + 2 * row_tile * 3 * 4)          # output buffers
    vmem_limit = int(min(0.9 * vmem_cap, max(footprint + (16 << 20), 32 << 20)))

    def in_index(i, p, j):
        return (i, p * hw_inner + j)

    def out_index(i, p, j):
        return (p, i, 0)

    in_kwargs = {}
    if row_tile * hw_tile * max_item < (1 << 20) and hw_inner > 2:
        in_kwargs["pipeline_mode"] = pl.Buffered(3)   # hide DMA latency on tiny blocks

    parts = pl.pallas_call(
        _combined_loss_kernel,
        out_shape=jax.ShapeDtypeStruct((hw_split, rows_p, 3), jnp.float32),
        grid_spec=pltpu.PrefetchScalarGridSpec(
            num_scalar_prefetch=0,
            grid=grid,
            in_specs=[
                pl.BlockSpec((row_tile, hw_tile), in_index, **in_kwargs),
                pl.BlockSpec((row_tile, hw_tile), in_index, **in_kwargs),
            ],
            out_specs=pl.BlockSpec((1, row_tile, 3), out_index),
            scratch_shapes=[
                pltpu.VMEM((row_tile, 128), jnp.float32),   # bce lane partials
                pltpu.VMEM((row_tile, 128), jnp.float32),   # intersection lane partials
                pltpu.VMEM((row_tile, 128), jnp.float32),   # union lane partials
            ],
        ),
        compiler_params=pltpu.CompilerParams(
            dimension_semantics=("parallel", "parallel", "arbitrary"),
            vmem_limit_bytes=vmem_limit,
        ),
    )(pred2, targ2)

    # Tiny final combine in plain JAX: sum hw-split partials, drop padded rows,
    # form the means / dice / alpha blend in f32 (also best accumulation precision).
    per_row = jnp.sum(parts, axis=0)[:rows]            # (rows, 3)
    bce_mean = jnp.sum(per_row[:, 0]) / jnp.float32(rows * hw)
    dice = (2.0 * per_row[:, 1] + smooth) / (per_row[:, 2] + smooth)
    dice_loss = 1.0 - jnp.mean(dice)
    return alpha * bce_mean + (1.0 - alpha) * dice_loss


if __name__ == "__main__":
    key = jax.random.PRNGKey(0)
    k1, k2 = jax.random.split(key)
    N, C, H, W = 2, 4, 16, 16
    pred = jax.random.normal(k1, (N, C, H, W), dtype=jnp.float32)
    target = (jax.random.uniform(k2, (N, C, H, W)) > 0.5).astype(jnp.float32)

    loss = combined_loss(pred, target, alpha=0.5, smooth=1e-6)
    jax.block_until_ready(loss)

    # Pure-JAX reference check (glue, not part of the kernel).
    x = pred.reshape(N * C, H * W)
    t = target.reshape(N * C, H * W)
    bce_ref = jnp.mean(jnp.maximum(x, 0.0) - x * t + jnp.log1p(jnp.exp(-jnp.abs(x))))
    p = jax.nn.sigmoid(x)
    inter = jnp.sum(p * t, axis=1)
    union = jnp.sum(p, axis=1) + jnp.sum(t, axis=1)
    dice_ref = 1.0 - jnp.mean((2.0 * inter + 1e-6) / (union + 1e-6))
    ref = 0.5 * bce_ref + 0.5 * dice_ref
    # Tolerance loosened for pl.reciprocal(approx=True) (~1e-4 relative on sigmoid).
    assert jnp.allclose(loss, ref, atol=1e-3, rtol=1e-3), (loss, ref)

    print("KERNEL_OK")
</pallas_src>

<mosaic_0001>
module attributes {stable_mosaic.version = 11 : i64} {
  func.func @_combined_loss_kernel(%arg0: i32, %arg1: i32, %arg2: i32, %arg3: memref<8x256xf32, #tpu.memory_space<vmem>>, %arg4: memref<8x256xbf16, #tpu.memory_space<vmem>>, %arg5: memref<1x8x3xf32, #tpu.memory_space<vmem>>, %arg6: memref<8x128xf32, #tpu.memory_space<vmem>>, %arg7: memref<8x128xf32, #tpu.memory_space<vmem>>, %arg8: memref<8x128xf32, #tpu.memory_space<vmem>>) attributes {dimension_semantics = [#tpu.dimension_semantics<parallel>, #tpu.dimension_semantics<parallel>, #tpu.dimension_semantics<arbitrary>], iteration_bounds = array<i64: 1, 1, 1>, scalar_prefetch = 0 : i64, scratch_operands = 3 : i64, tpu.core_type = #tpu.core_type<tc>, window_params = [{transform_indices = @transform_0, window_bounds = array<i64: 8, 256>}, {transform_indices = @transform_1, window_bounds = array<i64: 8, 256>}, {transform_indices = @transform_2, window_bounds = array<i64: 1, 8, 3>}]} {
    %c0_i32 = arith.constant 0 : i32
    %0 = arith.cmpi eq, %arg2, %c0_i32 : i32
    %1 = arith.extui %0 : i1 to i32
    %c0_i32_0 = arith.constant 0 : i32
    %2 = arith.cmpi ne, %1, %c0_i32_0 : i32
    scf.if %2 {
      %cst_21 = arith.constant 0.000000e+00 : f32
      %46 = vector.broadcast %cst_21 : f32 to vector<8x128xf32>
      %c0_22 = arith.constant 0 : index
      %c0_23 = arith.constant 0 : index
      %47 = vector.load %arg6[%c0_22, %c0_23] : memref<8x128xf32, #tpu.memory_space<vmem>>, vector<8x128xf32>
      tpu.vector_store %arg6[%c0_22, %c0_23], %46 {strides = array<i32>} : memref<8x128xf32, #tpu.memory_space<vmem>>, vector<8x128xf32>,
      %cst_24 = arith.constant 0.000000e+00 : f32
      %48 = vector.broadcast %cst_24 : f32 to vector<8x128xf32>
      %c0_25 = arith.constant 0 : index
      %c0_26 = arith.constant 0 : index
      %49 = vector.load %arg7[%c0_25, %c0_26] : memref<8x128xf32, #tpu.memory_space<vmem>>, vector<8x128xf32>
      tpu.vector_store %arg7[%c0_25, %c0_26], %48 {strides = array<i32>} : memref<8x128xf32, #tpu.memory_space<vmem>>, vector<8x128xf32>,
      %cst_27 = arith.constant 0.000000e+00 : f32
      %50 = vector.broadcast %cst_27 : f32 to vector<8x128xf32>
      %c0_28 = arith.constant 0 : index
      %c0_29 = arith.constant 0 : index
      %51 = vector.load %arg8[%c0_28, %c0_29] : memref<8x128xf32, #tpu.memory_space<vmem>>, vector<8x128xf32>
      tpu.vector_store %arg8[%c0_28, %c0_29], %50 {strides = array<i32>} : memref<8x128xf32, #tpu.memory_space<vmem>>, vector<8x128xf32>,
    } else {
    }
    %c0 = arith.constant 0 : index
    %c0_1 = arith.constant 0 : index
    %3 = vector.load %arg3[%c0, %c0_1] : memref<8x256xf32, #tpu.memory_space<vmem>>, vector<8x256xf32>
    %c0_2 = arith.constant 0 : index
    %c0_3 = arith.constant 0 : index
    %4 = vector.load %arg4[%c0_2, %c0_3] : memref<8x256xbf16, #tpu.memory_space<vmem>>, vector<8x256xbf16>
    %5 = arith.extf %4 : vector<8x256xbf16> to vector<8x256xf32>
    %6 = math.absf %3 : vector<8x256xf32>
    %cst = arith.constant 0.000000e+00 : f32
    %7 = vector.broadcast %cst : f32 to vector<8x256xf32>
    %8 = arith.subf %7, %6 : vector<8x256xf32>
    %9 = math.exp %8 : vector<8x256xf32>
    %cst_4 = arith.constant 0.000000e+00 : f32
    %10 = vector.broadcast %cst_4 : f32 to vector<8x256xf32>
    %11 = arith.maximumf %3, %10 : vector<8x256xf32>
    %12 = arith.mulf %3, %5 : vector<8x256xf32>
    %13 = arith.subf %11, %12 : vector<8x256xf32>
    %14 = math.log1p %9 : vector<8x256xf32>
    %15 = arith.addf %13, %14 : vector<8x256xf32>
    %cst_5 = arith.constant 1.000000e+00 : f32
    %16 = vector.broadcast %cst_5 : f32 to vector<8x256xf32>
    %17 = arith.addf %16, %9 : vector<8x256xf32>
    %18 = tpu.reciprocal %17 {approx = true} : vector<8x256xf32> -> vector<8x256xf32>
    %cst_6 = arith.constant 0.000000e+00 : f32
    %19 = vector.broadcast %cst_6 : f32 to vector<8x256xf32>
    %20 = arith.cmpf oge, %3, %19 : vector<8x256xf32>
    %21 = arith.mulf %9, %18 : vector<8x256xf32>
    %22 = arith.select %20, %18, %21 : vector<8x256xi1>, vector<8x256xf32>
    %c0_7 = arith.constant 0 : index
    %c0_8 = arith.constant 0 : index
    %23 = vector.load %arg6[%c0_7, %c0_8] : memref<8x128xf32, #tpu.memory_space<vmem>>, vector<8x128xf32>
    %24 = vector.extract_strided_slice %15 {offsets = [0, 0], sizes = [8, 128], strides = [1, 1]} : vector<8x256xf32> to vector<8x128xf32>
    %25 = vector.extract_strided_slice %15 {offsets = [0, 128], sizes = [8, 128], strides = [1, 1]} : vector<8x256xf32> to vector<8x128xf32>
    %26 = arith.addf %24, %25 : vector<8x128xf32>
    %27 = arith.addf %23, %26 : vector<8x128xf32>
    %c0_9 = arith.constant 0 : index
    %c0_10 = arith.constant 0 : index
    %28 = vector.load %arg6[%c0_9, %c0_10] : memref<8x128xf32, #tpu.memory_space<vmem>>, vector<8x128xf32>
    tpu.vector_store %arg6[%c0_9, %c0_10], %27 {strides = array<i32>} : memref<8x128xf32, #tpu.memory_space<vmem>>, vector<8x128xf32>,
    %c0_11 = arith.constant 0 : index
    %c0_12 = arith.constant 0 : index
    %29 = vector.load %arg7[%c0_11, %c0_12] : memref<8x128xf32, #tpu.memory_space<vmem>>, vector<8x128xf32>
    %30 = arith.mulf %22, %5 : vector<8x256xf32>
    %31 = vector.extract_strided_slice %30 {offsets = [0, 0], sizes = [8, 128], strides = [1, 1]} : vector<8x256xf32> to vector<8x128xf32>
    %32 = vector.extract_strided_slice %30 {offsets = [0, 128], sizes = [8, 128], strides = [1, 1]} : vector<8x256xf32> to vector<8x128xf32>
    %33 = arith.addf %31, %32 : vector<8x128xf32>
    %34 = arith.addf %29, %33 : vector<8x128xf32>
    %c0_13 = arith.constant 0 : index
    %c0_14 = arith.constant 0 : index
    %35 = vector.load %arg7[%c0_13, %c0_14] : memref<8x128xf32, #tpu.memory_space<vmem>>, vector<8x128xf32>
    tpu.vector_store %arg7[%c0_13, %c0_14], %34 {strides = array<i32>} : memref<8x128xf32, #tpu.memory_space<vmem>>, vector<8x128xf32>,
    %c0_15 = arith.constant 0 : index
    %c0_16 = arith.constant 0 : index
    %36 = vector.load %arg8[%c0_15, %c0_16] : memref<8x128xf32, #tpu.memory_space<vmem>>, vector<8x128xf32>
    %37 = arith.addf %22, %5 : vector<8x256xf32>
    %38 = vector.extract_strided_slice %37 {offsets = [0, 0], sizes = [8, 128], strides = [1, 1]} : vector<8x256xf32> to vector<8x128xf32>
    %39 = vector.extract_strided_slice %37 {offsets = [0, 128], sizes = [8, 128], strides = [1, 1]} : vector<8x256xf32> to vector<8x128xf32>
    %40 = arith.addf %38, %39 : vector<8x128xf32>
    %41 = arith.addf %36, %40 : vector<8x128xf32>
    %c0_17 = arith.constant 0 : index
    %c0_18 = arith.constant 0 : index
    %42 = vector.load %arg8[%c0_17, %c0_18] : memref<8x128xf32, #tpu.memory_space<vmem>>, vector<8x128xf32>
    tpu.vector_store %arg8[%c0_17, %c0_18], %41 {strides = array<i32>} : memref<8x128xf32, #tpu.memory_space<vmem>>, vector<8x128xf32>,
    %c0_i32_19 = arith.constant 0 : i32
    %43 = arith.cmpi eq, %arg2, %c0_i32_19 : i32
    %44 = arith.extui %43 : i1 to i32
    %c0_i32_20 = arith.constant 0 : i32
    %45 = arith.cmpi ne, %44, %c0_i32_20 : i32
    scf.if %45 {
      %c0_21 = arith.constant 0 : index
      %c0_22 = arith.constant 0 : index
      %46 = vector.load %arg6[%c0_21, %c0_22] : memref<8x128xf32, #tpu.memory_space<vmem>>, vector<8x128xf32>
      %cst_23 = arith.constant dense<0.000000e+00> : vector<8xf32>
      %47 = vector.multi_reduction <add>, %46, %cst_23 [1] : vector<8x128xf32> to vector<8xf32>
      %48 = vector.shape_cast %47 : vector<8xf32> to vector<8x1xf32>
      %c0_24 = arith.constant 0 : index
      %c0_25 = arith.constant 0 : index
      %c0_26 = arith.constant 0 : index
      %49 = vector.load %arg5[%c0_24, %c0_25, %c0_26] : memref<1x8x3xf32, #tpu.memory_space<vmem>>, vector<1x8x1xf32>
      %50 = vector.shape_cast %49 : vector<1x8x1xf32> to vector<8x1xf32>
      %51 = vector.shape_cast %48 : vector<8x1xf32> to vector<1x8x1xf32>
      tpu.vector_store %arg5[%c0_24, %c0_25, %c0_26], %51 {strides = array<i32>} : memref<1x8x3xf32, #tpu.memory_space<vmem>>, vector<1x8x1xf32>,
      %c0_27 = arith.constant 0 : index
      %c0_28 = arith.constant 0 : index
      %52 = vector.load %arg7[%c0_27, %c0_28] : memref<8x128xf32, #tpu.memory_space<vmem>>, vector<8x128xf32>
      %cst_29 = arith.constant dense<0.000000e+00> : vector<8xf32>
      %53 = vector.multi_reduction <add>, %52, %cst_29 [1] : vector<8x128xf32> to vector<8xf32>
      %54 = vector.shape_cast %53 : vector<8xf32> to vector<8x1xf32>
      %c0_30 = arith.constant 0 : index
      %c0_31 = arith.constant 0 : index
      %c1 = arith.constant 1 : index
      %55 = vector.load %arg5[%c0_30, %c0_31, %c1] : memref<1x8x3xf32, #tpu.memory_space<vmem>>, vector<1x8x1xf32>
      %56 = vector.shape_cast %55 : vector<1x8x1xf32> to vector<8x1xf32>
      %57 = vector.shape_cast %54 : vector<8x1xf32> to vector<1x8x1xf32>
      tpu.vector_store %arg5[%c0_30, %c0_31, %c1], %57 {strides = array<i32>} : memref<1x8x3xf32, #tpu.memory_space<vmem>>, vector<1x8x1xf32>,
      %c0_32 = arith.constant 0 : index
      %c0_33 = arith.constant 0 : index
      %58 = vector.load %arg8[%c0_32, %c0_33] : memref<8x128xf32, #tpu.memory_space<vmem>>, vector<8x128xf32>
      %cst_34 = arith.constant dense<0.000000e+00> : vector<8xf32>
      %59 = vector.multi_reduction <add>, %58, %cst_34 [1] : vector<8x128xf32> to vector<8xf32>
      %60 = vector.shape_cast %59 : vector<8xf32> to vector<8x1xf32>
      %c0_35 = arith.constant 0 : index
      %c0_36 = arith.constant 0 : index
      %c2 = arith.constant 2 : index
      %61 = vector.load %arg5[%c0_35, %c0_36, %c2] : memref<1x8x3xf32, #tpu.memory_space<vmem>>, vector<1x8x1xf32>
      %62 = vector.shape_cast %61 : vector<1x8x1xf32> to vector<8x1xf32>
      %63 = vector.shape_cast %60 : vector<8x1xf32> to vector<1x8x1xf32>
      tpu.vector_store %arg5[%c0_35, %c0_36, %c2], %63 {strides = array<i32>} : memref<1x8x3xf32, #tpu.memory_space<vmem>>, vector<1x8x1xf32>,
    } else {
    }
    return
  }
  func.func @transform_0(%arg0: i32, %arg1: i32, %arg2: i32) -> (i32, i32) {
    %c1_i32 = arith.constant 1 : i32
    %0 = arith.muli %arg1, %c1_i32 : i32
    %1 = arith.addi %0, %arg2 : i32
    %c0_i32 = arith.constant 0 : i32
    return %arg0, %1 : i32, i32
  }
  func.func @transform_1(%arg0: i32, %arg1: i32, %arg2: i32) -> (i32, i32) {
    %c1_i32 = arith.constant 1 : i32
    %0 = arith.muli %arg1, %c1_i32 : i32
    %1 = arith.addi %0, %arg2 : i32
    %c0_i32 = arith.constant 0 : i32
    return %arg0, %1 : i32, i32
  }
  func.func @transform_2(%arg0: i32, %arg1: i32, %arg2: i32) -> (i32, i32, i32) {
    %c0_i32 = arith.constant 0 : i32
    %c0_i32_0 = arith.constant 0 : i32
    return %arg1, %arg0, %c0_i32 : i32, i32, i32
  }
}

</mosaic_0001>

<bundles_post_ra>
// kernel: tpu_custom_call.1
= control target key start
LH: loop header
LB: loop body
LE: loop exit
PB: predicated region body
PF: predicated region fallthrough
CT: control target
= control target key end

     0   :  { %7 = vsyncpa [#allocation6], 0  ;;  %s245_s0 = inlined_call_operand.hbm [shape: f32[8,256], index: 0, kind: input, shape index: {}]   ;;  %s246_s1 = inlined_call_operand.hbm [shape: bf16[8,256], index: 1, kind: input, shape index: {}]   ;;  %s247_s2 = inlined_call_operand.vmem [shape: f32[1,8,3], index: 2, kind: output, shape index: {}]  }
   0x1   :  { %s18_s11 = sshll.u32 %s245_s0, 4  ;;  %s19_s11 = int_to_ptr.hbm [resolvable:$true] %s18_s11 }
   0x2   :  { %8 = vsyncpa [#allocation8], 0  ;;  %s213_s12 = smov [#allocation5]   ;;  %s33_s16 = sshll.u32 %s246_s1, 4  ;;  %s34_s16 = int_to_ptr.hbm [resolvable:$true] %s33_s16 }
   0x3   :  { %s20_s13 = sshll.u32 %s213_s12, 4  ;;  %s214_s17 = smov [#allocation7]   ;;  %s21_s13 = int_to_ptr.vmem [resolvable:$true] %s20_s13 }
   0x4   :  { %23 = dma.hbm_to_vmem [thread:$0]  %s19_s11, 256, %s21_s13, [#allocation6]  }
   0x5   :  { %s35_s18 = sshll.u32 %s214_s17, 4  ;;  %s36_s18 = int_to_ptr.vmem [resolvable:$true] %s35_s18 }
   0x6   :  { %38 = dma.hbm_to_vmem [thread:$0]  %s34_s16, 128, %s36_s18, [#allocation8]  }
   0x7   :  { %209 = dma.done.wait [#allocation6], 256  }
   0x8   :  { %210 = vsyncadd [#allocation6], 4294967040 }
   0x9   :  { %211 = dma.done.wait [#allocation8], 128  }
   0xa   :  { %212 = vsyncadd [#allocation8], 4294967168  ;;  %v58_v0 = vld [vmem:[#allocation5] sm:$0xff]  ;;  %v59_v1 = vld [vmem:[#allocation5 + $0x8] sm:$0xff]  ;;  %vm129_vm4 = vcmask 7168   ;;  %vm134_vm5 = vcmask 15368  }
   0xb   :  { %v63_v2 = vand.u32 2147483647, %v58_v0  ;;  %v64_v3 = vand.u32 2147483647, %v59_v1  ;;  %v60_v8 = vld [vmem:[#allocation7] sm:$0xff]  ;;  %v71_v17 = vmax.f32 %v58_v0, 0.0 }
   0xc   :  { %v61_v11 = vunpack.c.l.bf16 %v60_v8  ;;  %v62_v14 = vunpack.c.h.bf16 %v60_v8  ;;  %v72_v22 = vmax.f32 %v59_v1, 0.0  ;;  %vm101_vm2 = vcmp.ge.f32.partialorder %v58_v0, 0.0 }
   0xd   :  { %v65_v4 = vsub.f32 0.0, %v63_v2  ;;  %v66_v5 = vsub.f32 0.0, %v64_v3  ;;  %vm102_vm3 = vcmp.ge.f32.partialorder %v59_v1, 0.0  ;;  %vm139_vm6 = vcmask 23568  }
   0xe   :  { %v73_v19 = vmul.f32 %v61_v11, %v58_v0  ;;  %v74_v23 = vmul.f32 %v62_v14, %v59_v1 }
   0xf   :  { %v67_v6 = vmul.f32 1.442695, %v65_v4  ;;  %v69_v7 = vmul.f32 1.442695, %v66_v5 }
  0x10   :  { %v75_v27 = vsub.f32 %v71_v17, %v73_v19  ;;  %v76_v30 = vsub.f32 %v72_v22, %v74_v23 }
  0x11   :  { %149 = vpow2.f32 %v67_v6 }
  0x12   :  { %151 = vpow2.f32 %v69_v7 }
  0x17   :  { %v150_v9 = vpop.eup %149 }
  0x18   :  { %v152_v10 = vpop.eup %151  ;;  %v77_v12 = vadd.f32 1.0, %v150_v9  ;;  %v80_v13 = vmul.f32 -0.5, %v150_v9  ;;  %v83_v20 = vand.u32 2147483647, %v150_v9 }
  0x19   :  { %v86_v15 = vadd.f32 1.0, %v152_v10  ;;  %v89_v16 = vmul.f32 -0.5, %v152_v10  ;;  %v92_v24 = vand.u32 2147483647, %v152_v10 }
  0x1a   :  { %153 = vlog2.f32 %v77_v12  ;;  %v81_v18 = vadd.f32 1.0, %v80_v13  ;;  %vm84_vm0 = vcmp.lt.f32.partialorder %v83_v20, 0.0004427343 }
  0x1b   :  { %155 = vlog2.f32 %v86_v15  ;;  %v90_v21 = vadd.f32 1.0, %v89_v16  ;;  %vm93_vm1 = vcmp.lt.f32.partialorder %v92_v24, 0.0004427343 }
  0x1c   :  { %157 = vrcp.f32 %v77_v12  ;;  %v82_v25 = vmul.f32 %v150_v9, %v81_v18 }
  0x1d   :  { %159 = vrcp.f32 %v86_v15  ;;  %v91_v28 = vmul.f32 %v152_v10, %v90_v21 }
  0x20   :  { %v154_v26 = vpop.eup %153 }
  0x21   :  { %v156_v29 = vpop.eup %155  ;;  %v79_v31 = vmul.f32 0.6931472, %v154_v26 }
  0x22   :  { %v158_v32 = vpop.eup %157  ;;  %v88_v33 = vmul.f32 0.6931472, %v156_v29 }
  0x23   :  { %v160_v34 = vpop.eup %159  ;;  %v85_v35 = vsel %vm84_vm0, %v82_v25, %v79_v31  ;;  %v103_v36 = vmul.f32 %v158_v32, %v150_v9 }
  0x24   :  { %v94_v37 = vsel %vm93_vm1, %v91_v28, %v88_v33  ;;  %v95_v38 = vadd.f32 %v85_v35, %v75_v27  ;;  %v104_v39 = vmul.f32 %v160_v34, %v152_v10 }
  0x25   :  { %v96_v40 = vadd.f32 %v94_v37, %v76_v30  ;;  %v105_v41 = vsel %vm101_vm2, %v158_v32, %v103_v36 }
  0x26   :  { %v106_v42 = vsel %vm102_vm3, %v160_v34, %v104_v39  ;;  %v118_v43 = vadd.f32 %v105_v41, %v61_v11  ;;  %v112_v46 = vmul.f32 %v105_v41, %v61_v11 }
  0x27   :  { %v108_v44 = vadd.f32 %v96_v40, %v95_v38  ;;  %v119_v45 = vadd.f32 %v106_v42, %v62_v14  ;;  %v113_v47 = vmul.f32 %v106_v42, %v62_v14 }
  0x29   :  { %127 = vadd.xlane.f32.xlu0 %v108_v44  ;;  %v120_v48 = vadd.f32 %v119_v45, %v118_v43  ;;  %v114_v49 = vadd.f32 %v113_v47, %v112_v46 }
  0x2b   :  { %137 = vadd.xlane.f32.xlu1 %v120_v48 }
  0x31   :  { %132 = vadd.xlane.f32.xlu0 %v114_v49 }
  0x9c   :  { %v128_v50 = vpop.xlane.xlu0 %127 }
  0x9d   :  { %130 = vst.msk [vmem:[%s247_s2] sm:$0xff] %vm129_vm4, %v128_v50 }
  0x9e   :  { %v138_v51 = vpop.xlane.xlu1 %137 }
  0xa4   :  { %v133_v52 = vpop.xlane.xlu0 %132 }
  0xa5   :  { %135 = vst.msk [vmem:[%s247_s2] sm:$0xff] %vm134_vm5, %v133_v52 }
  0xa6   :  { %140 = vst.msk [vmem:[%s247_s2] sm:$0xff] %vm139_vm6, %v138_v51 }
  0xa7   :  { %145 = vsyncpa [#allocation6], 1 }
  0xa8   :  { %146 = vsyncpa [#allocation8], 1 }

</bundles_post_ra>
